<compile_context>
chip_gen: v7x
topology: tpu7x:2x2x1
jax: 0.10.0
libtpu: 0.0.40
codegen_flags: <defaults>
</compile_context>

<pallas_src>
import math

import jax
import jax.numpy as jnp
from jax.experimental import pallas as pl
from jax.experimental.pallas import tpu as pltpu


def _pick_images_per_block(N, C, HW, itemsize,
                           target_bytes=1 << 20, max_block_rows=512):
    """Images per grid step: ~1 MiB x-blocks, bounded block-diag weight size."""
    per_image = max(C * HW * itemsize, 1)
    nb = min(N, max(1, target_bytes // per_image))
    nb = min(nb, max(1, max_block_rows // C))   # keep (nb*C)^2 weights small
    if nb >= N:
        return N                                # whole batch resident, grid=(1,)
    # Block rows (nb*C) must be a multiple of 8 (sublane tile) when < full dim.
    step = 8 // math.gcd(C, 8)
    nb = max(step, (nb // step) * step)
    return min(nb, N)


def feature_refine(x, w1, b1, w2, b2, *, images_per_block=None):
    """x: (N, C, H, W) NCHW. Linear weights w*: (C, C) PyTorch (out, in); b*: (C,)."""
    N, C, H, W = x.shape
    HW = H * W
    nb = images_per_block or _pick_images_per_block(N, C, HW, x.dtype.itemsize)
    rows = nb * C
    inv_hw = float(1.0 / HW)

    # Packed 2-D slab: rows = batch*channel (full sublanes), lanes = H*W.
    x2 = x.reshape(N * C, HW)

    # Lift the per-image Linear layers to block-diagonal (I_nb ⊗ W) form so one
    # matmul per layer covers all nb images (and, via the 2 columns, both the
    # max and avg branches).  Built once in plain XLA outside the kernel.
    f32 = jnp.float32
    eye = jnp.eye(nb, dtype=f32)
    w1bd = jnp.kron(eye, w1.astype(f32))                          # (rows, rows)
    w2bd = jnp.kron(eye, w2.astype(f32))                          # (rows, rows)
    b1r = jnp.tile(b1.astype(f32).reshape(1, C), (nb, 1)).reshape(rows, 1)
    b2r = jnp.tile(b2.astype(f32).reshape(1, C), (nb, 1)).reshape(rows, 1)

    def kernel(x_ref, w1_ref, b1_ref, w2_ref, b2_ref, o_ref):
        x_blk = x_ref[...]                                        # (rows, HW), native dtype
        # Whole-spatial pooling (pool_dim == H == W): one value per (image, channel).
        c_max = jnp.max(x_blk, axis=1, keepdims=True).astype(f32)             # (rows, 1)
        c_avg = jnp.sum(x_blk, axis=1, keepdims=True, dtype=f32) * inv_hw     # (rows, 1)
        # Put the two branches side by side: column 0 = max, column 1 = avg.
        col = jax.lax.broadcasted_iota(jnp.int32, (rows, 2), 1)
        v = jnp.where(col == 0, c_max, c_avg)                     # (rows, 2)
        # Fused MLP: one matmul per layer for both branches and all nb images.
        h = jnp.dot(w1_ref[...], v, preferred_element_type=f32) + b1_ref[...]
        h = jnp.maximum(h, 0.0)                                   # ReLU
        y = jnp.dot(w2_ref[...], h, preferred_element_type=f32) + b2_ref[...]
        # sigmoid(mlp(max) + mlp(avg)), already in row layout for the multiply.
        gate = jax.nn.sigmoid(jnp.sum(y, axis=1, keepdims=True))  # (rows, 1)
        # Gated multiply in the native dtype (no f32 copy of the slab).
        o_ref[...] = (x_blk * gate.astype(x_blk.dtype)).astype(o_ref.dtype)

    grid = (pl.cdiv(N, nb),)
    out = pl.pallas_call(
        kernel,
        out_shape=jax.ShapeDtypeStruct((N * C, HW), x.dtype),
        grid_spec=pltpu.PrefetchScalarGridSpec(
            num_scalar_prefetch=0,
            grid=grid,
            in_specs=[
                pl.BlockSpec((rows, HW), lambda n: (n, 0)),
                pl.BlockSpec((rows, rows), lambda n: (0, 0)),
                pl.BlockSpec((rows, 1), lambda n: (0, 0)),
                pl.BlockSpec((rows, rows), lambda n: (0, 0)),
                pl.BlockSpec((rows, 1), lambda n: (0, 0)),
            ],
            out_specs=pl.BlockSpec((rows, HW), lambda n: (n, 0)),
        ),
        compiler_params=pltpu.CompilerParams(
            dimension_semantics=("parallel",),        # no cross-step dependency
            vmem_limit_bytes=32 * 1024 * 1024,        # explicit; safe on v5e/v6e/v7x
        ),
    )(x2, w1bd, b1r, w2bd, b2r)

    return out.reshape(N, C, H, W)


def feature_refine_ref(x, w1, b1, w2, b2):
    """Pure-JAX reference matching the PyTorch forward."""
    c_mx = jnp.max(x, axis=(2, 3))                                # (N, C)
    c_av = jnp.mean(x, axis=(2, 3))                               # (N, C)

    def mlp(v):
        h = jnp.maximum(v @ w1.T + b1, 0.0)
        return h @ w2.T + b2

    gate = jax.nn.sigmoid(mlp(c_mx) + mlp(c_av))                  # (N, C)
    return x * gate[:, :, None, None]


if __name__ == "__main__":
    N, C, H, W = 2, 4, 16, 16   # pool_dim = 16 == H == W (required by reshape(N, C))

    key = jax.random.PRNGKey(0)
    kx, k1, k2, k3, k4 = jax.random.split(key, 5)

    x = jax.random.normal(kx, (N, C, H, W), dtype=jnp.float32)
    # Deterministic Linear parameters (PyTorch shapes: weight (out, in), bias (out,)).
    bound = 1.0 / jnp.sqrt(C)
    w1 = jax.random.uniform(k1, (C, C), jnp.float32, -bound, bound)
    b1 = jax.random.uniform(k2, (C,), jnp.float32, -bound, bound)
    w2 = jax.random.uniform(k3, (C, C), jnp.float32, -bound, bound)
    b2 = jax.random.uniform(k4, (C,), jnp.float32, -bound, bound)

    out = feature_refine(x, w1, b1, w2, b2)
    out = jax.block_until_ready(out)

    ref = feature_refine_ref(x, w1, b1, w2, b2)
    assert out.shape == (N, C, H, W)
    assert jnp.allclose(out, ref, atol=1e-5, rtol=1e-5), "mismatch vs pure-JAX reference"

    print("KERNEL_OK")
</pallas_src>

<mosaic_0001>
module attributes {stable_mosaic.version = 11 : i64} {
  func.func @kernel(%arg0: i32, %arg1: memref<8x256xf32, #tpu.memory_space<vmem>>, %arg2: memref<8x8xf32, #tpu.memory_space<vmem>>, %arg3: memref<8x1xf32, #tpu.memory_space<vmem>>, %arg4: memref<8x8xf32, #tpu.memory_space<vmem>>, %arg5: memref<8x1xf32, #tpu.memory_space<vmem>>, %arg6: memref<8x256xf32, #tpu.memory_space<vmem>>) attributes {dimension_semantics = [#tpu.dimension_semantics<parallel>], iteration_bounds = array<i64: 1>, scalar_prefetch = 0 : i64, scratch_operands = 0 : i64, tpu.core_type = #tpu.core_type<tc>, window_params = [{transform_indices = @transform_0, window_bounds = array<i64: 8, 256>}, {pipeline_mode = #tpu.pipeline_mode<synchronous>, transform_indices = @transform_1, window_bounds = array<i64: 8, 8>}, {pipeline_mode = #tpu.pipeline_mode<synchronous>, transform_indices = @transform_2, window_bounds = array<i64: 8, 1>}, {pipeline_mode = #tpu.pipeline_mode<synchronous>, transform_indices = @transform_3, window_bounds = array<i64: 8, 8>}, {pipeline_mode = #tpu.pipeline_mode<synchronous>, transform_indices = @transform_4, window_bounds = array<i64: 8, 1>}, {transform_indices = @transform_5, window_bounds = array<i64: 8, 256>}]} {
    %c0 = arith.constant 0 : index
    %c0_0 = arith.constant 0 : index
    %0 = vector.load %arg1[%c0, %c0_0] : memref<8x256xf32, #tpu.memory_space<vmem>>, vector<8x256xf32>
    %cst = arith.constant dense<0xFF800000> : vector<8xf32>
    %1 = vector.multi_reduction <maximumf>, %0, %cst [1] : vector<8x256xf32> to vector<8xf32>
    %2 = vector.shape_cast %1 : vector<8xf32> to vector<8x1xf32>
    %cst_1 = arith.constant dense<0.000000e+00> : vector<8xf32>
    %3 = vector.multi_reduction <add>, %0, %cst_1 [1] : vector<8x256xf32> to vector<8xf32>
    %4 = vector.shape_cast %3 : vector<8xf32> to vector<8x1xf32>
    %cst_2 = arith.constant 3.906250e-03 : f32
    %5 = vector.broadcast %cst_2 : f32 to vector<8x1xf32>
    %6 = arith.mulf %4, %5 : vector<8x1xf32>
    %7 = tpu.iota {dimensions = array<i32: 1>} : vector<8x2xi32>
    %c0_i32 = arith.constant 0 : i32
    %8 = vector.broadcast %c0_i32 : i32 to vector<8x2xi32>
    %9 = arith.cmpi eq, %7, %8 : vector<8x2xi32>
    %10 = vector.shape_cast %2 : vector<8x1xf32> to vector<8x1xf32>
    %11 = vector.broadcast %10 : vector<8x1xf32> to vector<8x2xf32>
    %12 = vector.shape_cast %6 : vector<8x1xf32> to vector<8x1xf32>
    %13 = vector.broadcast %12 : vector<8x1xf32> to vector<8x2xf32>
    %14 = arith.select %9, %11, %13 : vector<8x2xi1>, vector<8x2xf32>
    %c0_3 = arith.constant 0 : index
    %c0_4 = arith.constant 0 : index
    %15 = vector.load %arg2[%c0_3, %c0_4] : memref<8x8xf32, #tpu.memory_space<vmem>>, vector<8x8xf32>
    %cst_5 = arith.constant dense<0.000000e+00> : vector<8x2xf32>
    %16 = tpu.matmul %15, %14, %cst_5 {dimension_numbers = #tpu.dot_dimension_numbers<[1], [0], [0], [1], [0, 0, 1, 1], [], []>} : vector<8x8xf32>, vector<8x2xf32>, vector<8x2xf32> -> vector<8x2xf32>
    %c0_6 = arith.constant 0 : index
    %c0_7 = arith.constant 0 : index
    %17 = vector.load %arg3[%c0_6, %c0_7] : memref<8x1xf32, #tpu.memory_space<vmem>>, vector<8x1xf32>
    %18 = vector.broadcast %17 : vector<8x1xf32> to vector<8x2xf32>
    %19 = arith.addf %16, %18 : vector<8x2xf32>
    %cst_8 = arith.constant 0.000000e+00 : f32
    %20 = vector.broadcast %cst_8 : f32 to vector<8x2xf32>
    %21 = arith.maximumf %19, %20 : vector<8x2xf32>
    %c0_9 = arith.constant 0 : index
    %c0_10 = arith.constant 0 : index
    %22 = vector.load %arg4[%c0_9, %c0_10] : memref<8x8xf32, #tpu.memory_space<vmem>>, vector<8x8xf32>
    %cst_11 = arith.constant dense<0.000000e+00> : vector<8x2xf32>
    %23 = tpu.matmul %22, %21, %cst_11 {dimension_numbers = #tpu.dot_dimension_numbers<[1], [0], [0], [1], [0, 0, 1, 1], [], []>} : vector<8x8xf32>, vector<8x2xf32>, vector<8x2xf32> -> vector<8x2xf32>
    %c0_12 = arith.constant 0 : index
    %c0_13 = arith.constant 0 : index
    %24 = vector.load %arg5[%c0_12, %c0_13] : memref<8x1xf32, #tpu.memory_space<vmem>>, vector<8x1xf32>
    %25 = vector.broadcast %24 : vector<8x1xf32> to vector<8x2xf32>
    %26 = arith.addf %23, %25 : vector<8x2xf32>
    %cst_14 = arith.constant dense<0.000000e+00> : vector<8xf32>
    %27 = vector.multi_reduction <add>, %26, %cst_14 [1] : vector<8x2xf32> to vector<8xf32>
    %28 = vector.shape_cast %27 : vector<8xf32> to vector<8x1xf32>
    %29 = arith.negf %28 : vector<8x1xf32>
    %30 = math.exp %29 : vector<8x1xf32>
    %cst_15 = arith.constant 1.000000e+00 : f32
    %31 = vector.broadcast %cst_15 : f32 to vector<8x1xf32>
    %32 = arith.addf %31, %30 : vector<8x1xf32>
    %33 = arith.divf %31, %32 : vector<8x1xf32>
    %34 = vector.broadcast %33 : vector<8x1xf32> to vector<8x256xf32>
    %35 = arith.mulf %0, %34 : vector<8x256xf32>
    %c0_16 = arith.constant 0 : index
    %c0_17 = arith.constant 0 : index
    %36 = vector.load %arg6[%c0_16, %c0_17] : memref<8x256xf32, #tpu.memory_space<vmem>>, vector<8x256xf32>
    tpu.vector_store %arg6[%c0_16, %c0_17], %35 {strides = array<i32>} : memref<8x256xf32, #tpu.memory_space<vmem>>, vector<8x256xf32>,
    return
  }
  func.func @transform_0(%arg0: i32) -> (i32, i32) {
    %c0_i32 = arith.constant 0 : i32
    %c0_i32_0 = arith.constant 0 : i32
    return %arg0, %c0_i32 : i32, i32
  }
  func.func @transform_1(%arg0: i32) -> (i32, i32) {
    %c0_i32 = arith.constant 0 : i32
    %c0_i32_0 = arith.constant 0 : i32
    %c0_i32_1 = arith.constant 0 : i32
    return %c0_i32, %c0_i32_0 : i32, i32
  }
  func.func @transform_2(%arg0: i32) -> (i32, i32) {
    %c0_i32 = arith.constant 0 : i32
    %c0_i32_0 = arith.constant 0 : i32
    %c0_i32_1 = arith.constant 0 : i32
    return %c0_i32, %c0_i32_0 : i32, i32
  }
  func.func @transform_3(%arg0: i32) -> (i32, i32) {
    %c0_i32 = arith.constant 0 : i32
    %c0_i32_0 = arith.constant 0 : i32
    %c0_i32_1 = arith.constant 0 : i32
    return %c0_i32, %c0_i32_0 : i32, i32
  }
  func.func @transform_4(%arg0: i32) -> (i32, i32) {
    %c0_i32 = arith.constant 0 : i32
    %c0_i32_0 = arith.constant 0 : i32
    %c0_i32_1 = arith.constant 0 : i32
    return %c0_i32, %c0_i32_0 : i32, i32
  }
  func.func @transform_5(%arg0: i32) -> (i32, i32) {
    %c0_i32 = arith.constant 0 : i32
    %c0_i32_0 = arith.constant 0 : i32
    return %arg0, %c0_i32 : i32, i32
  }
}

</mosaic_0001>

<bundles_post_ra>
// kernel: tpu_custom_call.1
= control target key start
LH: loop header
LB: loop body
LE: loop exit
PB: predicated region body
PF: predicated region fallthrough
CT: control target
= control target key end

     0   :  { %10 = vsyncpa [#allocation3], 0  ;;  %s387_s0 = inlined_call_operand.vmem [shape: f32[8,256], index: 0, kind: input, shape index: {}]   ;;  %s388_s1 = inlined_call_operand.hbm [shape: f32[8,8], index: 1, kind: input, shape index: {}]   ;;  %s389_s2 = inlined_call_operand.vmem [shape: f32[8,1], index: 2, kind: input, shape index: {}]   ;;  %s390_s3 = inlined_call_operand.vmem [shape: f32[8,8], index: 3, kind: input, shape index: {}]   ;;  %s391_s4 = inlined_call_operand.vmem [shape: f32[8,1], index: 4, kind: input, shape index: {}]   ;;  %s392_s5 = inlined_call_operand.hbm [shape: f32[8,256], index: 5, kind: output, shape index: {}]  }
   0x1   :  { %11 = vsyncpa [#allocation4], 0  ;;  %s313_s18 = smov [#allocation2]   ;;  %s265_s22 = scalar_lea.hbm %s388_s1, 128 }
   0x2   :  { %s20_s19 = sshll.u32 %s313_s18, 4  ;;  %p266_p0 = scmp.ne.s32.totalorder %s388_s1, %s265_s22  ;;  %s21_s19 = int_to_ptr.vmem [resolvable:$true] %s20_s19 }
   0x3   :  { %p269_p1 = scmp.lt.u32.totalorder %s265_s22, %s388_s1 }
   0x5   :  { %p271_p2 = pnand %p269_p1, %p266_p0 }
   0x7   :  { %274 = shalt.err (!%p271_p2)
}
   0x8   :  { %s275_s27 = scalar_lea.vmem %s21_s19, 128  ;;  %p280_p4 = scmp.lt.s32.totalorder %s21_s19, %s21_s19 }
   0x9   :  { %p276_p3 = scmp.ne.s32.totalorder %s21_s19, %s275_s27  ;;  %p281_p5 = scmp.lt.s32.totalorder %s275_s27, %s275_s27 }
   0xb   :  { %p282_p6 = por %p281_p5, %p280_p4 }
   0xd   :  { %p283_p7 = pnand %p282_p6, %p276_p3 }
   0xf   :  { %286 = shalt.err (!%p283_p7)
}
  0x10   :  { %23 = dma.hbm_to_vmem [thread:$0]  %s388_s1, 128, %s21_s19, [#allocation3]  }
  0x11   :  { %309 = dma.done.wait [#allocation3], 128  }
  0x12   :  { %310 = vsyncadd [#allocation3], 4294967168  ;;  %v33_v0 = vld [vmem:[%s387_s0] sm:$0xff]  ;;  %v34_v1 = vld [vmem:[%s387_s0 + $0x8] sm:$0xff]  ;;  %v314_v4 = vmov 0.0   ;;  %vm315_vm0 = vmmov 0   ;;  %v42_v8 = vlaneseq }
  0x13   :  { %v38_v2 = vadd.f32 %v34_v1, %v33_v0  ;;  %v35_v3 = vmax.f32 %v33_v0, %v34_v1  ;;  %244 = vmatprep.subr.mxu0 %v314_v4  ;;  %249 = vmatprep.subr.mxu1 %v314_v4  ;;  %v47_v5 = vld [vmem:[%s389_s2] sm:$0xff]  ;;  %v316_v6 = vmov 0   ;;  %vm53_vm2 = vcmask 64512  }
  0x14   :  { %246 = vmatprep.mubr.msk.f32.mxu0 %vm315_vm0, %v314_v4  ;;  %251 = vmatprep.mubr.msk.f32.mxu1 %vm315_vm0, %v314_v4  ;;  %v129_v7 = vld [vmem:[%s391_s4] sm:$0xff]  ;;  %v43_v9 = vand.u32 127, %v42_v8  ;;  %vm208_vm3 = vcmask 15360   ;;  %s317_s4 = smov [#allocation5]  }
  0x15   :  { %39 = vadd.xlane.f32.xlu0 %v38_v2  ;;  %259 = vset.pattern.permute.xlu1 %v316_v6  ;;  %v46_v13 = vld [vmem:[#allocation2] sm:$0xff]  ;;  %s228_s12 = sshll.u32 %s317_s4, 4  ;;  %s229_s12 = int_to_ptr.vmem [resolvable:$true] %s228_s12 }
  0x16   :  { %260 = vset.pattern.permute.xlu0 %v316_v6  ;;  %50 = vperm.xlu1 %259, %v47_v5   ;;  %vm44_vm1 = vcmp.eq.s32.totalorder %v43_v9, 0  ;;  %v128_v20 = vld [vmem:[%s390_s3] sm:$0xff]  ;;  %s287_s3 = scalar_lea.vmem %s229_s12, 256  ;;  %p292_p9 = scmp.lt.s32.totalorder %s229_s12, %s229_s12 }
  0x17   :  { %p288_p8 = scmp.ne.s32.totalorder %s229_s12, %s287_s3  ;;  %p293_p10 = scmp.lt.s32.totalorder %s287_s3, %s287_s3 }
  0x19   :  { %36 = vmax.xlane.f32.xlu0 %v35_v3  ;;  %p294_p11 = por %p293_p10, %p292_p9 }
  0x1a   :  { %132 = vperm.xlu1 %259, %v129_v7  }
  0x1b   :  { %p295_p12 = pnand %p294_p11, %p288_p8 }
  0x95   :  { %v51_v15 = vpop.permute.xlu1 %50 }
  0x99   :  { %v133_v21 = vpop.permute.xlu1 %132 }
  0xa2   :  { %v40_v10 = vpop.xlane.xlu0 %39 }
  0xa3   :  { %v41_v11 = vmul.f32 0.00390625, %v40_v10 }
  0xa6   :  { %v37_v12 = vpop.xlane.xlu0 %36 }
  0xa7   :  { %v45_v14 = vsel %vm44_vm1, %v37_v12, %v41_v11 }
  0xa8   :  { %245 = vmatpush3.msra.mxu0 %v45_v14 }
  0xa9   :  { %247 = vmatmul.mubr.msk.f32.vlgmr.msra.gmra.mrb[0].mxu0 %vm53_vm2, %v46_v13 }
 0x17c   :  { %v123_v16 = vpop.f32.mrb[0].mxu0 }
 0x17d   :  { %v124_v17 = vadd.f32 %v123_v16, %v51_v15  ;;  %v248_v18 = vpop.f32.mrb[1].mxu0 }
 0x17f   :  { %v127_v19 = vmax.f32 %v124_v17, 0.0 }
 0x181   :  { %250 = vmatpush3.msra.mxu1 %v127_v19 }
 0x182   :  { %252 = vmatmul.mubr.msk.f32.vlgmr.msra.gmra.mrb[0].mxu1 %vm53_vm2, %v128_v20 }
 0x255   :  { %v204_v22 = vpop.f32.mrb[0].mxu1 }
 0x256   :  { %v205_v23 = vadd.f32 %v204_v22, %v133_v21  ;;  %v253_v24 = vpop.f32.mrb[1].mxu1 }
 0x258   :  { %v209_v25 = vsel %vm208_vm3, %v205_v23, 0.0 }
 0x259   :  { %210 = vadd.xlane.f32.xlu0 %v209_v25 }
 0x2e6   :  { %v211_v26 = vpop.xlane.xlu0 %210 }
 0x2e7   :  { %v239_v27 = vmul.f32 -1.442695, %v211_v26 }
 0x2e9   :  { %261 = vpow2.f32 %v239_v27 }
 0x2f3   :  { %v262_v28 = vpop.eup %261 }
 0x2f4   :  { %v215_v29 = vadd.f32 1.0, %v262_v28 }
 0x2f6   :  { %263 = vrcp.f32 %v215_v29 }
 0x300   :  { %v264_v30 = vpop.eup %263 }
 0x301   :  { %v218_v31 = vmul.f32 %v264_v30, %v33_v0  ;;  %v219_v32 = vmul.f32 %v264_v30, %v34_v1 }
 0x303   :  { %220 = vst [vmem:[#allocation5] sm:$0xff] %v218_v31  ;;  %221 = vst [vmem:[#allocation5 + $0x8] sm:$0xff] %v219_v32 }
 0x304   :  { %298 = shalt.err (!%p295_p12)
}
 0x305   :  { %s299_s15 = scalar_lea.hbm %s392_s5, 256 }
 0x306   :  { %p300_p13 = scmp.ne.s32.totalorder %s392_s5, %s299_s15  ;;  %p303_p0 = scmp.lt.u32.totalorder %s299_s15, %s392_s5 }
 0x308   :  { %p305_p1 = pnand %p303_p0, %p300_p13 }
 0x30a   :  { %308 = shalt.err (!%p305_p1)
}
 0x30b   :  { %231 = dma.vmem_to_hbm [thread:$0]  %s229_s12, 256, %s392_s5, [#allocation4]  }
 0x30c   :  { %311 = dma.done.wait [#allocation4], 256  }
 0x30d   :  { %312 = vsyncadd [#allocation4], 4294967040 }
 0x30e   :  { %235 = vsyncpa [#allocation3], 1 }
 0x30f   :  { %236 = vsyncpa [#allocation4], 1 }

</bundles_post_ra>
